<compile_context>
chip_gen: v7x
topology: tpu7x:2x2x1
jax: 0.10.0
libtpu: 0.0.40
codegen_flags: <defaults>
</compile_context>

<pallas_src>
import functools

import jax
import jax.numpy as jnp
from jax import lax
from jax.experimental import pallas as pl
from jax.experimental.pallas import tpu as pltpu


def _round_up(a, b):
    return ((a + b - 1) // b) * b


# ------------------- fused pass: copy x + per-block stddev sums ----------------

def _make_fused_kernel(chw_valid, chw_tile, group_size, eps, needs_mask):
    """Copy the x block to the output and emit this block's sum of group stddevs."""
    inv_gm1 = 1.0 / float(group_size - 1)

    def kernel(x_ref, o_ref, p_ref):
        # x_ref / o_ref: (G, m_tile, chw_tile);  p_ref: (1, 1, 1, 1) f32.
        blk = x_ref[...]
        o_ref[...] = blk                                   # lane-dense copy

        blk32 = blk.astype(jnp.float32)
        mean = jnp.mean(blk32, axis=0, keepdims=True)      # reduce over group axis
        d = blk32 - mean
        var = jnp.sum(d * d, axis=0) * inv_gm1             # (m_tile, chw_tile)
        std = jnp.sqrt(var + eps)
        if needs_mask:                                     # ragged / padded columns
            col = (pl.program_id(1) * chw_tile
                   + lax.broadcasted_iota(jnp.int32, std.shape, 1))
            std = jnp.where(col < chw_valid, std, 0.0)
        p_ref[...] = jnp.full((1, 1, 1, 1), jnp.sum(std), dtype=jnp.float32)

    return kernel


def _choose_chw_tile(chw_eff, group_size, m_tile, itemsize, budget_bytes=10 << 20):
    """Largest 128-multiple tile keeping (in+out) x 2 buffers under the VMEM budget."""
    per_col = group_size * m_tile * itemsize
    max_cols = budget_bytes // (4 * per_col)
    max_cols = max(128, (max_cols // 128) * 128)
    return int(min(max_cols, chw_eff))


# --------------------- fill pass: write only the std channel -------------------

def _fill_std_kernel(s_ref, prev_ref, o_ref):
    # s_ref: (1,1) f32 in SMEM.  prev_ref: aliased full buffer (unused; it is an
    # input only so input_output_aliases keeps the fused pass's copy in place).
    del prev_ref
    o_ref[...] = jnp.full(o_ref.shape, s_ref[0, 0], dtype=o_ref.dtype)


# ------------------------------- module forward --------------------------------

def minibatch_stddev(x, group_size=4, eps=1e-8):
    """MiniBatchStdDev.forward: append one channel filled with the mean group std."""
    b, c, h, w = x.shape
    assert b % group_size == 0, "batch must be divisible by group_size"
    assert group_size >= 2, "group_size must be >= 2 (unbiased var of 1 sample is NaN)"
    g = group_size
    m = b // g
    hw = h * w
    chw = c * hw
    cp1hw = (c + 1) * hw
    itemsize = jnp.dtype(x.dtype).itemsize

    # Layout-preserving view: x3[g_idx, m_idx, :] is sample g_idx*m + m_idx
    # flattened over (C, H, W) -- identical columns to x.view(group_size, -1).
    x3 = x.reshape(g, m, chw)
    chw_eff = chw
    if chw % 128 != 0:
        # Rare fallback only when C*H*W is not lane-aligned; padded columns are
        # masked out of the statistics below (hot path never pads).
        chw_eff = _round_up(chw, 128)
        x3 = jnp.pad(x3, ((0, 0), (0, 0), (0, chw_eff - chw)))

    m_tile = 8 if (m > 8 and m % 8 == 0) else m
    chw_tile = _choose_chw_tile(chw_eff, g, m_tile, itemsize)
    grid_m = m // m_tile
    grid_c = int(pl.cdiv(chw_eff, chw_tile))
    needs_mask = (grid_c * chw_tile != chw)

    kernel = _make_fused_kernel(chw, chw_tile, g, eps, needs_mask)
    out3, partials = pl.pallas_call(
        kernel,
        grid=(grid_m, grid_c),
        in_specs=[pl.BlockSpec((g, m_tile, chw_tile), lambda mi, ci: (0, mi, ci))],
        out_specs=[
            # x lands at the same column offsets inside the (C+1)*H*W rows; the
            # std tail [chw, cp1hw) is filled by the aliased fill pass below.
            pl.BlockSpec((g, m_tile, chw_tile), lambda mi, ci: (0, mi, ci)),
            pl.BlockSpec((1, 1, 1, 1), lambda mi, ci: (mi, ci, 0, 0)),
        ],
        out_shape=[
            jax.ShapeDtypeStruct((g, m, cp1hw), x.dtype),
            jax.ShapeDtypeStruct((grid_m, grid_c, 1, 1), jnp.float32),
        ],
        compiler_params=pltpu.CompilerParams(
            dimension_semantics=("parallel", "parallel")),
        cost_estimate=pl.CostEstimate(
            flops=4 * g * m * chw_eff,
            transcendentals=m * chw_eff,
            bytes_accessed=2 * b * chw * itemsize),
    )(x3)

    # Mean of the per-position group stddev over all N = M*C*H*W positions.
    s = (jnp.sum(partials, dtype=jnp.float32) / float(m * chw)).reshape(1, 1)

    # Write only the std channel of the SAME buffer (aliased => in place, no
    # re-copy of the feature map).
    out4 = out3.reshape(b, c + 1, h, w)
    out = pl.pallas_call(
        _fill_std_kernel,
        grid=(b,),
        in_specs=[
            pl.BlockSpec(memory_space=pltpu.MemorySpace.SMEM),   # std scalar
            pl.BlockSpec(memory_space=pl.ANY),                   # aliased buffer
        ],
        out_specs=pl.BlockSpec((1, 1, h, w), lambda i: (i, c, 0, 0)),
        out_shape=jax.ShapeDtypeStruct((b, c + 1, h, w), x.dtype),
        input_output_aliases={1: 0},
        compiler_params=pltpu.CompilerParams(dimension_semantics=("arbitrary",)),
    )(s, out4)
    return out


# ----------------------------------- main --------------------------------------

if __name__ == "__main__":
    batch, channels, size = 4, 4, 16       # group_size=4 requires batch % 4 == 0
    group_size = 4

    key = jax.random.PRNGKey(0)
    x = jax.random.normal(key, (batch, channels, size, size), jnp.float32)

    fwd = jax.jit(functools.partial(minibatch_stddev, group_size=group_size))
    out = jax.block_until_ready(fwd(x))

    # pure-JAX reference check (same math as the PyTorch module)
    grouped = x.reshape(group_size, -1)
    std_ref = jnp.sqrt(jnp.var(grouped, axis=0, ddof=1) + 1e-8)
    s_ref = jnp.mean(std_ref)
    ref = jnp.concatenate(
        [x, jnp.broadcast_to(s_ref, (batch, 1, size, size))], axis=1)

    assert out.shape == (batch, channels + 1, size, size), out.shape
    assert jnp.allclose(out, ref, rtol=1e-5, atol=1e-5), \
        float(jnp.max(jnp.abs(out - ref)))
    print("KERNEL_OK")
</pallas_src>

<mosaic_0001>
module attributes {stable_mosaic.version = 11 : i64} {
  func.func @kernel(%arg0: i32, %arg1: i32, %arg2: memref<4x1x1024xf32, #tpu.memory_space<vmem>>, %arg3: memref<4x1x1024xf32, #tpu.memory_space<vmem>>, %arg4: memref<1x1x1x1xf32, #tpu.memory_space<vmem>>) attributes {dimension_semantics = [#tpu.dimension_semantics<parallel>, #tpu.dimension_semantics<parallel>], iteration_bounds = array<i64: 1, 1>, scalar_prefetch = 0 : i64, scratch_operands = 0 : i64, tpu.core_type = #tpu.core_type<tc>, window_params = [{transform_indices = @transform_0, window_bounds = array<i64: 4, 1, 1024>}, {transform_indices = @transform_1, window_bounds = array<i64: 4, 1, 1024>}, {transform_indices = @transform_2, window_bounds = array<i64: 1, 1, 1, 1>}]} {
    %c0 = arith.constant 0 : index
    %c0_0 = arith.constant 0 : index
    %c0_1 = arith.constant 0 : index
    %0 = vector.load %arg2[%c0, %c0_0, %c0_1] : memref<4x1x1024xf32, #tpu.memory_space<vmem>>, vector<4x1x1024xf32>
    %c0_2 = arith.constant 0 : index
    %c0_3 = arith.constant 0 : index
    %c0_4 = arith.constant 0 : index
    %1 = vector.load %arg3[%c0_2, %c0_3, %c0_4] : memref<4x1x1024xf32, #tpu.memory_space<vmem>>, vector<4x1x1024xf32>
    tpu.vector_store %arg3[%c0_2, %c0_3, %c0_4], %0 {strides = array<i32>} : memref<4x1x1024xf32, #tpu.memory_space<vmem>>, vector<4x1x1024xf32>,
    %cst = arith.constant dense<0.000000e+00> : vector<1x1024xf32>
    %2 = vector.multi_reduction <add>, %0, %cst [0] : vector<4x1x1024xf32> to vector<1x1024xf32>
    %3 = vector.shape_cast %2 : vector<1x1024xf32> to vector<1x1x1024xf32>
    %cst_5 = arith.constant 4.000000e+00 : f32
    %4 = vector.broadcast %cst_5 : f32 to vector<1x1x1024xf32>
    %5 = arith.divf %3, %4 : vector<1x1x1024xf32>
    %6 = vector.broadcast %5 : vector<1x1x1024xf32> to vector<4x1x1024xf32>
    %7 = arith.subf %0, %6 : vector<4x1x1024xf32>
    %8 = arith.mulf %7, %7 : vector<4x1x1024xf32>
    %cst_6 = arith.constant dense<0.000000e+00> : vector<1x1024xf32>
    %9 = vector.multi_reduction <add>, %8, %cst_6 [0] : vector<4x1x1024xf32> to vector<1x1024xf32>
    %cst_7 = arith.constant 0.333333343 : f32
    %10 = vector.broadcast %cst_7 : f32 to vector<1x1024xf32>
    %11 = arith.mulf %9, %10 : vector<1x1024xf32>
    %cst_8 = arith.constant 9.99999993E-9 : f32
    %12 = vector.broadcast %cst_8 : f32 to vector<1x1024xf32>
    %13 = arith.addf %11, %12 : vector<1x1024xf32>
    %14 = math.sqrt %13 : vector<1x1024xf32>
    %15 = vector.shape_cast %14 : vector<1x1024xf32> to vector<1x1x1024xf32>
    %cst_9 = arith.constant dense<0.000000e+00> : vector<1xf32>
    %16 = vector.multi_reduction <add>, %15, %cst_9 [1, 2] : vector<1x1x1024xf32> to vector<1xf32>
    %17 = vector.shape_cast %16 : vector<1xf32> to vector<1x1x1xf32>
    %18 = vector.extract %17[0, 0, 0] : f32 from vector<1x1x1xf32>
    %19 = vector.broadcast %18 : f32 to vector<1x1x1x1xf32>
    %c0_10 = arith.constant 0 : index
    %c0_11 = arith.constant 0 : index
    %c0_12 = arith.constant 0 : index
    %c0_13 = arith.constant 0 : index
    %20 = vector.load %arg4[%c0_10, %c0_11, %c0_12, %c0_13] : memref<1x1x1x1xf32, #tpu.memory_space<vmem>>, vector<1x1x1x1xf32>
    tpu.vector_store %arg4[%c0_10, %c0_11, %c0_12, %c0_13], %19 {strides = array<i32>} : memref<1x1x1x1xf32, #tpu.memory_space<vmem>>, vector<1x1x1x1xf32>,
    return
  }
  func.func @transform_0(%arg0: i32, %arg1: i32) -> (i32, i32, i32) {
    %c0_i32 = arith.constant 0 : i32
    %c0_i32_0 = arith.constant 0 : i32
    return %c0_i32, %arg0, %arg1 : i32, i32, i32
  }
  func.func @transform_1(%arg0: i32, %arg1: i32) -> (i32, i32, i32) {
    %c0_i32 = arith.constant 0 : i32
    %c0_i32_0 = arith.constant 0 : i32
    return %c0_i32, %arg0, %arg1 : i32, i32, i32
  }
  func.func @transform_2(%arg0: i32, %arg1: i32) -> (i32, i32, i32, i32) {
    %c0_i32 = arith.constant 0 : i32
    %c0_i32_0 = arith.constant 0 : i32
    %c0_i32_1 = arith.constant 0 : i32
    return %arg0, %arg1, %c0_i32, %c0_i32_0 : i32, i32, i32, i32
  }
}

module attributes {stable_mosaic.version = 11 : i64} {
  func.func @_fill_std_kernel(%arg0: i32, %arg1: memref<1x1xf32, #tpu.memory_space<smem>>, %arg2: memref<4x5x16x16xf32, #tpu.memory_space<any>>, %arg3: memref<1x1x16x16xf32, #tpu.memory_space<vmem>>) attributes {dimension_semantics = [#tpu.dimension_semantics<arbitrary>], iteration_bounds = array<i64: 4>, scalar_prefetch = 0 : i64, scratch_operands = 0 : i64, tpu.core_type = #tpu.core_type<tc>, window_params = [{transform_indices = @transform_0, window_bounds = array<i64: 1, 1>}, {}, {transform_indices = @transform_2, window_bounds = array<i64: 1, 1, 16, 16>}]} {
    %c0 = arith.constant 0 : index
    %c0_0 = arith.constant 0 : index
    %0 = memref.load %arg1[%c0, %c0_0] : memref<1x1xf32, #tpu.memory_space<smem>>
    %1 = vector.broadcast %0 : f32 to vector<1x1x16x16xf32>
    %c0_1 = arith.constant 0 : index
    %c0_2 = arith.constant 0 : index
    %c0_3 = arith.constant 0 : index
    %c0_4 = arith.constant 0 : index
    %2 = vector.load %arg3[%c0_1, %c0_2, %c0_3, %c0_4] : memref<1x1x16x16xf32, #tpu.memory_space<vmem>>, vector<1x1x16x16xf32>
    tpu.vector_store %arg3[%c0_1, %c0_2, %c0_3, %c0_4], %1 {strides = array<i32>} : memref<1x1x16x16xf32, #tpu.memory_space<vmem>>, vector<1x1x16x16xf32>,
    return
  }
  func.func @transform_0(%arg0: i32) -> (i32, i32) {
    %c0_i32 = arith.constant 0 : i32
    %c0_i32_0 = arith.constant 0 : i32
    %c0_i32_1 = arith.constant 0 : i32
    return %c0_i32, %c0_i32_0 : i32, i32
  }
  func.func @transform_2(%arg0: i32) -> (i32, i32, i32, i32) {
    %c4_i32 = arith.constant 4 : i32
    %c0_i32 = arith.constant 0 : i32
    %c0_i32_0 = arith.constant 0 : i32
    %c0_i32_1 = arith.constant 0 : i32
    return %arg0, %c4_i32, %c0_i32, %c0_i32_0 : i32, i32, i32, i32
  }
}

</mosaic_0001>

<bundles_post_ra>
// kernel: minibatch_stddev.3
= control target key start
LH: loop header
LB: loop body
LE: loop exit
PB: predicated region body
PF: predicated region fallthrough
CT: control target
= control target key end

     0   :  { %s397_s0 = inlined_call_operand.<no memory space> [shape: f32[1,1], index: 0, kind: input, shape index: {}]   ;;  %s398_s1 = inlined_call_operand.hbm [shape: f32[4,5,16,16], index: 1, kind: input, shape index: {}, may-alias: {1,2}]   ;;  %s399_s2 = inlined_call_operand.hbm [shape: f32[4,5,16,16], index: 2, kind: output, shape index: {}, may-alias: {1,2}]  }
   0x1   :  { %7 = sst [smem:[#allocation2]] %s397_s0 }
   0x2   :  { %8 = vsyncpa [#allocation4], 0 }
   0x3   :  { %10 = vsyncpa [#allocation4 + $0x1], 0  ;;  %s304_s11 = smov 0   ;;  %s306_s12 = smov 0  }
   0x4   :  { %s308_s13 = smov 0   ;;  %s310_s14 = smov 0  }
   0x5 LB: > { %s168_s0 = sadd.s32 4294967295, %s281_s14   ;;  %s169_s1 = sadd.s32 4294967294, %s281_s14   ;;  %s281_s14 = sphi %s310_s14, %s405_s14   ;;  %s277_s13 = sphi %s308_s13, %s404_s13   ;;  %s273_s12 = sphi %s306_s12, %s403_s12   ;;  %s269_s11 = sphi %s304_s11, %s402_s11  }
   0x6   : > { %s327_s15 = sadd.s32 1, %s281_s14   ;;  %s44_s16 = sadd.s32 1, %s277_s13 }
   0x7   : > { %s41_s17 = ssub.s32 %s281_s14, %s327_s15  ;;  %p54_p0 = scmp.ne.s32.totalorder %s277_s13, %s273_s12 }
   0x8   : > { %p42_p1 = scmp.eq.s32.totalorder %s41_s17, 0  ;;  %p55_p2 = scmp.eq.s32.totalorder %s168_s0, 3 }
   0x9   : > { %p60_p3 = scmp.ne.s32.totalorder %s273_s12, %s269_s11  ;;  %p61_p4 = scmp.eq.s32.totalorder %s169_s1, 3 }
   0xa   : > { %s337_s18 = scalar_select %p42_p1, %s277_s13, %s44_s16  }
   0xb   : > { %p339_p5 = por %p55_p2, %p54_p0  ;;  %p343_p6 = por %p61_p4, %p60_p3 }
   0xc   : > { %p171_p7 = scmp.ge.s32.totalorder %s281_s14, 1  ;;  %p82_p8 = scmp.lt.s32.totalorder %s281_s14, 5 }
   0xe   : > { %p83_p9 = pnand %p171_p7, %p82_p8 }
   0xf   : > { %s94_s21 = sand.u32 (!%p83_p9), 1, %s273_s12   ;;  %s97_s22 = sld [smem:[#allocation2]] (!%p83_p9)  ;;  %vm99_vm0 = vcmask (!%p83_p9), 130048  }
  0x10   : > { %86 = sbr.rel (%p83_p9) target bundleno = 44 (0x2c), region = 24  ;;  %s172_s23 = sshll.u32 (!%p83_p9), %s94_s21, 4 }
  0x11   : > { %s174_s24 = smul.u32 (!%p83_p9), 1280, %s168_s0  ;;  %s96_s25 = scalar_lea.vmem (!%p83_p9), [#allocation3], %s172_s23 }
  0x12   : > { %s117_s26 = sshll.u32 (!%p83_p9), %s96_s25, 4  ;;  %s357_s3 = scalar_lea.sflag (!%p83_p9), [#allocation4], %s94_s21  ;;  %s350_s26 = int_to_ptr.vmem [resolvable:$true] %s117_s26 }
  0x13   : > { %s149_s29 = scalar_lea.hbm (!%p83_p9), %s399_s2, %s174_s24  ;;  %s218_s4 = scalar_lea.vmem (!%p83_p9), %s350_s26, 256 }
  0x14   : > { %s355_s30 = scalar_lea.hbm (!%p83_p9), %s149_s29, 1024  ;;  %p219_p10 = scmp.ne.s32.totalorder (!%p83_p9), %s350_s26, %s218_s4 }
  0x15   : > { %v98_v0 = vstv (!%p83_p9), %s97_s22  ;;  %s283_s5 = smov (!%p83_p9), [#allocation3]  }
  0x16   : > { %100 = vst.msk [vmem:[%s96_s25] sm:$0xff] (!%p83_p9), %vm99_vm0, %v98_v0  ;;  %101 = vst.msk [vmem:[%s96_s25 + $0x8] sm:$0xff] (!%p83_p9), %vm99_vm0, %v98_v0  ;;  %p220_p11 = pnand (!%p83_p9), %p219_p10, %p339_p5  ;;  %s222_s6 = sshll.u32 (!%p83_p9), %s283_s5, 4  ;;  %s223_s6 = int_to_ptr.vmem [resolvable:$false] %s222_s6 }
  0x17   : > { %s224_s7 = scalar_lea.vmem %s223_s6, 512  ;;  %p225_p13 = scmp.lt.s32.totalorder %s350_s26, %s223_s6 }
  0x18   : > { %p221_p12 = pneg %p220_p11  ;;  %p226_p0 = scmp.lt.s32.totalorder %s224_s7, %s218_s4 }
  0x1a   : > { %p227_p1 = por %p226_p0, %p225_p13 }
  0x1c   : > { %p228_p2 = pnand %p227_p1, %p221_p12 }
  0x1e   : > { %231 = shalt.err (!%p228_p2)
}
  0x1f   : > { %s246_s8 = scalar_lea.hbm %s149_s29, 1280  ;;  %s236_s0 = scalar_lea.hbm %s399_s2, 5120 }
  0x20   : > { %p233_p3 = scmp.ne.s32.totalorder %s355_s30, %s246_s8  ;;  %p237_p8 = scmp.lt.u32.totalorder %s355_s30, %s399_s2 }
  0x21   : > { %p238_p9 = scmp.lt.u32.totalorder %s236_s0, %s246_s8  ;;  %p240_p11 = scmp.lt.u32.totalorder %s246_s8, %s355_s30 }
  0x22   : > { %p234_p4 = pnand %p233_p3, %p339_p5 }
  0x23   : > { %p239_p10 = por %p238_p9, %p237_p8 }
  0x24   : > { %p235_p7 = pneg %p234_p4 }
  0x25   : > { %p241_p12 = por %p240_p11, %p239_p10 }
  0x27   : > { %p242_p13 = pnand %p241_p12, %p235_p7 }
  0x29   : > { %245 = shalt.err (!%p242_p13)
}
  0x2a   : > { %s284_s17 = smov 128   ;;  %s285_s21 = smov 8  }
  0x2b   : > { %177 = dma.vmem_to_hbm [thread:$0]  (%p339_p5), %s350_s26, 256, %s355_s30, %s357_s3, %s284_s17, %s284_s17, %s285_s21  }
  0x2c PF: > { %p183_p0 = scmp.ge.s32.totalorder %s281_s14, 2  ;;  %s132_s22 = sand.u32 1, %s269_s11  }
  0x2d   : > { %s133_s23 = scalar_lea.sflag [#allocation4], %s132_s22 }
  0x2e   : > { %p180_p1 = pnand %p183_p0, %p343_p6 }
  0x30   : > { %264 = dma.done.wait (!%p180_p1), %s133_s23, 256  }
  0x31   : > { %266 = vsyncadd (!%p180_p1), %s133_s23, 4294967040  ;;  %p13_p2 = scmp.ge.s32.totalorder %s327_s15, 6   ;;  %s402_s11 = smov %s273_s12 }
  0x32   : > { %s403_s12 = smov %s277_s13  ;;  %s404_s13 = smov %s337_s18 }
  0x33   : > { %s405_s14 = smov %s327_s15  ;;  %15 = sbr.rel (!%p13_p2) target bundleno = 5 (0x5), region = 56 }
  0x3a   :  { %138 = vsyncpa [#allocation4], 1 }
  0x3b   :  { %140 = vsyncpa [#allocation4 + $0x1], 1 }

// kernel: minibatch_stddev.2
= control target key start
LH: loop header
LB: loop body
LE: loop exit
PB: predicated region body
PF: predicated region fallthrough
CT: control target
= control target key end

     0   :  { %8 = vsyncpa [#allocation4], 0  ;;  %v23_v2 = vlaneseq  ;;  %vm183_vm0 = vcmask 1040384   ;;  %v744_v6 = vmov 1966171168   ;;  %s1135_s0 = inlined_call_operand.vmem [shape: f32[4,1,1024], index: 0, kind: input, shape index: {}]   ;;  %s1136_s1 = inlined_call_operand.vmem [shape: f32[4,1,1280], index: 1, kind: output, shape index: {0}]   ;;  %s1137_s2 = inlined_call_operand.hbm [shape: f32[1,1,1,1], index: 2, kind: output, shape index: {1}]  }
   0x1   :  { %v764_v0 = vld [vmem:[%s1135_s0] sm:$0xff]  ;;  %v769_v1 = vld [vmem:[%s1135_s0 + $0x8] sm:$0xff]  ;;  %v774_v3 = vld [vmem:[%s1135_s0 + $0x10] sm:$0xff]  ;;  %v799_v7 = vunpack.c.l.s4 %v744_v6 }
   0x2   :  { %v779_v4 = vld [vmem:[%s1135_s0 + $0x18] sm:$0xff]  ;;  %670 = vst [vmem:[%s1136_s1] sm:$0xff] %v764_v0  ;;  %672 = vst [vmem:[%s1136_s1 + $0xa] sm:$0xff] %v769_v1  ;;  %v789_v5 = vshrl.u32 %v23_v2, 7 }
   0x3   :  { %674 = vst [vmem:[%s1136_s1 + $0x14] sm:$0xff] %v774_v3  ;;  %676 = vst [vmem:[%s1136_s1 + $0x1e] sm:$0xff] %v779_v4  ;;  %s745_s1 = smov [#allocation3]  }
   0x4   :  { %v802_v8 = vsub.s32 0, %v789_v5  ;;  %v805_v9 = vsub.s32 1, %v789_v5  ;;  %v808_v10 = vsub.s32 2, %v789_v5  ;;  %v811_v11 = vsub.s32 3, %v789_v5  ;;  %s686_s24 = sshll.u32 %s745_s1, 4  ;;  %s687_s24 = int_to_ptr.vmem [resolvable:$true] %s686_s24 }
   0x5   :  { %v814_v12 = vsub.s32 4, %v789_v5  ;;  %v817_v13 = vsub.s32 5, %v789_v5  ;;  %v820_v14 = vsub.s32 6, %v789_v5  ;;  %v823_v15 = vsub.s32 7, %v789_v5  ;;  %s720_s26 = scalar_lea.vmem %s687_s24, 16  ;;  %s724_s27 = scalar_lea.vmem %s687_s24, 32 }
   0x6   :  { %v26_v16 = vrot.slane %v764_v0, %v802_v8  ;;  %v30_v17 = vrot.slane %v764_v0, %v805_v9  ;;  %v34_v18 = vrot.slane %v764_v0, %v808_v10  ;;  %v38_v19 = vrot.slane %v764_v0, %v811_v11  ;;  %p721_p0 = scmp.ne.s32.totalorder %s687_s24, %s720_s26  ;;  %p725_p1 = scmp.lt.s32.totalorder %s687_s24, %s687_s24 }
   0x7   :  { %v42_v20 = vrot.slane %v764_v0, %v814_v12  ;;  %v46_v21 = vrot.slane %v764_v0, %v817_v13  ;;  %v50_v22 = vrot.slane %v764_v0, %v820_v14  ;;  %v54_v23 = vrot.slane %v764_v0, %v823_v15  ;;  %p726_p2 = scmp.lt.s32.totalorder %s724_s27, %s720_s26 }
   0x8   :  { %v58_v24 = vrot.slane %v769_v1, %v802_v8  ;;  %v62_v25 = vrot.slane %v769_v1, %v805_v9  ;;  %v66_v26 = vrot.slane %v769_v1, %v808_v10  ;;  %v70_v27 = vrot.slane %v769_v1, %v811_v11 }
   0x9   :  { %v74_v28 = vrot.slane %v769_v1, %v814_v12  ;;  %v78_v29 = vrot.slane %v769_v1, %v817_v13  ;;  %v82_v30 = vrot.slane %v769_v1, %v820_v14  ;;  %v86_v31 = vrot.slane %v769_v1, %v823_v15  ;;  %p727_p3 = por %p726_p2, %p725_p1 }
   0xa   :  { %v90_v32 = vrot.slane %v774_v3, %v802_v8  ;;  %v94_v33 = vrot.slane %v774_v3, %v805_v9  ;;  %v98_v34 = vrot.slane %v774_v3, %v808_v10  ;;  %v102_v35 = vrot.slane %v774_v3, %v811_v11 }
   0xb   :  { %v106_v36 = vrot.slane %v774_v3, %v814_v12  ;;  %v110_v37 = vrot.slane %v774_v3, %v817_v13  ;;  %v114_v38 = vrot.slane %v774_v3, %v820_v14  ;;  %v118_v39 = vrot.slane %v774_v3, %v823_v15  ;;  %p728_p4 = pnand %p727_p3, %p721_p0 }
   0xc   :  { %v122_v40 = vrot.slane %v779_v4, %v802_v8  ;;  %v126_v41 = vrot.slane %v779_v4, %v805_v9  ;;  %v130_v42 = vrot.slane %v779_v4, %v808_v10  ;;  %v134_v43 = vrot.slane %v779_v4, %v811_v11 }
   0xd   :  { %v138_v44 = vrot.slane %v779_v4, %v814_v12  ;;  %v142_v45 = vrot.slane %v779_v4, %v817_v13  ;;  %v146_v46 = vrot.slane %v779_v4, %v820_v14  ;;  %v150_v47 = vrot.slane %v779_v4, %v823_v15 }
   0xe   :  { %v184_v48 = vsel %vm183_vm0, %v26_v16, 0.0  ;;  %v185_v49 = vsel %vm183_vm0, %v58_v24, 0.0  ;;  %v187_v50 = vsel %vm183_vm0, %v90_v32, 0.0  ;;  %v189_v51 = vsel %vm183_vm0, %v122_v40, 0.0 }
   0xf   :  { %v186_v52 = vadd.f32 %v185_v49, %v184_v48  ;;  %v191_v53 = vsel %vm183_vm0, %v30_v17, 0.0  ;;  %v192_v54 = vsel %vm183_vm0, %v62_v25, 0.0  ;;  %v194_v55 = vsel %vm183_vm0, %v94_v33, 0.0 }
  0x10   :  { %v193_v56 = vadd.f32 %v192_v54, %v191_v53  ;;  %v196_v57 = vsel %vm183_vm0, %v126_v41, 0.0  ;;  %v198_v58 = vsel %vm183_vm0, %v34_v18, 0.0  ;;  %v199_v59 = vsel %vm183_vm0, %v66_v26, 0.0 }
  0x11   :  { %v188_v60 = vadd.f32 %v187_v50, %v186_v52  ;;  %v200_v61 = vadd.f32 %v199_v59, %v198_v58  ;;  %v201_v62 = vsel %vm183_vm0, %v98_v34, 0.0  ;;  %v203_v63 = vsel %vm183_vm0, %v130_v42, 0.0 }
  0x12   :  { %v195_v2 = vadd.f32 %v194_v55, %v193_v56  ;;  %v205_v6 = vsel %vm183_vm0, %v38_v19, 0.0  ;;  %v206_v16 = vsel %vm183_vm0, %v70_v27, 0.0  ;;  %v208_v17 = vsel %vm183_vm0, %v102_v35, 0.0 }
  0x13   :  { %v190_v24 = vadd.f32 %v189_v51, %v188_v60  ;;  %v202_v25 = vadd.f32 %v201_v62, %v200_v61  ;;  %v207_v32 = vadd.f32 %v206_v16, %v205_v6  ;;  %v210_v18 = vsel %vm183_vm0, %v134_v43, 0.0 }
  0x14   :  { %v197_v33 = vadd.f32 %v196_v57, %v195_v2  ;;  %v212_v26 = vsel %vm183_vm0, %v42_v20, 0.0  ;;  %v213_v40 = vsel %vm183_vm0, %v74_v28, 0.0  ;;  %v215_v34 = vsel %vm183_vm0, %v106_v36, 0.0 }
  0x15   :  { %v204_v41 = vadd.f32 %v203_v63, %v202_v25  ;;  %v209_v42 = vadd.f32 %v208_v17, %v207_v32  ;;  %v214_v48 = vadd.f32 %v213_v40, %v212_v26  ;;  %v217_v19 = vsel %vm183_vm0, %v138_v44, 0.0 }
  0x16   :  { %v219_v27 = vsel %vm183_vm0, %v46_v21, 0.0  ;;  %v220_v35 = vsel %vm183_vm0, %v78_v29, 0.0  ;;  %v222_v49 = vsel %vm183_vm0, %v110_v37, 0.0  ;;  %v224_v43 = vsel %vm183_vm0, %v142_v45, 0.0 }
  0x17   :  { %v211_v50 = vadd.f32 %v210_v18, %v209_v42  ;;  %v216_v51 = vadd.f32 %v215_v34, %v214_v48  ;;  %v221_v20 = vadd.f32 %v220_v35, %v219_v27  ;;  %v226_v28 = vsel %vm183_vm0, %v50_v22, 0.0 }
  0x18   :  { %v227_v36 = vsel %vm183_vm0, %v82_v30, 0.0  ;;  %v229_v44 = vsel %vm183_vm0, %v114_v38, 0.0  ;;  %v231_v21 = vsel %vm183_vm0, %v146_v46, 0.0  ;;  %v233_v29 = vsel %vm183_vm0, %v54_v23, 0.0 }
  0x19   :  { %v218_v37 = vadd.f32 %v217_v19, %v216_v51  ;;  %v223_v45 = vadd.f32 %v222_v49, %v221_v20  ;;  %v228_v52 = vadd.f32 %v227_v36, %v226_v28  ;;  %v234_v53 = vsel %vm183_vm0, %v86_v31, 0.0 }
  0x1a   :  { %v235_v22 = vadd.f32 %v234_v53, %v233_v29  ;;  %v236_v30 = vsel %vm183_vm0, %v118_v39, 0.0  ;;  %v238_v38 = vsel %vm183_vm0, %v150_v47, 0.0  ;;  %v241_v54 = vmul.f32 0.25, %v190_v24 }
  0x1b   :  { %v225_v46 = vadd.f32 %v224_v43, %v223_v45  ;;  %v230_v55 = vadd.f32 %v229_v44, %v228_v52  ;;  %v242_v56 = vmul.f32 0.25, %v197_v33  ;;  %v243_v57 = vmul.f32 0.25, %v204_v41 }
  0x1c   :  { %v237_v58 = vadd.f32 %v236_v30, %v235_v22  ;;  %v244_v23 = vmul.f32 0.25, %v211_v50  ;;  %v245_v59 = vmul.f32 0.25, %v218_v37  ;;  %v263_v60 = vunpack.c.0.s8 %v799_v7 }
  0x1d   :  { %v232_v61 = vadd.f32 %v231_v21, %v230_v55  ;;  %v246_v62 = vmul.f32 0.25, %v225_v46  ;;  %v257_v63 = vcombine.low %v241_v54, %v242_v56 }
  0x1e   :  { %v239_v2 = vadd.f32 %v238_v38, %v237_v58  ;;  %v258_v31 = vcombine.low %v243_v57, %v244_v23  ;;  %v266_v6 = vsub.s32 %v263_v60, %v789_v5 }
  0x1f   :  { %v247_v39 = vmul.f32 0.25, %v232_v61  ;;  %v259_v16 = vcombine.low %v245_v59, %v246_v62 }
  0x20   :  { %v248_v47 = vmul.f32 0.25, %v239_v2  ;;  %v267_v17 = vrot.slane %v257_v63, %v266_v6  ;;  %v274_v24 = vrot.slane %v258_v31, %v266_v6 }
  0x21   :  { %v281_v32 = vrot.slane %v259_v16, %v266_v6 }
  0x22   :  { %v260_v25 = vcombine.low %v247_v39, %v248_v47  ;;  %v289_v18 = vcombine.low %v267_v17, %v274_v24 }
  0x24   :  { %v288_v33 = vrot.slane %v260_v25, %v266_v6  ;;  %v297_v40 = vrot.slane %v289_v18, %v266_v6 }
  0x26   :  { %v290_v26 = vcombine.low %v281_v32, %v288_v33 }
  0x28   :  { %v304_v34 = vrot.slane %v290_v26, %v266_v6 }
  0x2a   :  { %v305_v7 = vcombine.low %v297_v40, %v304_v34 }
  0x2c   :  { %v307_v41 = vsub.f32 %v764_v0, %v305_v7  ;;  %v308_v42 = vsub.f32 %v769_v1, %v305_v7  ;;  %v309_v48 = vsub.f32 %v774_v3, %v305_v7  ;;  %v310_v5 = vsub.f32 %v779_v4, %v305_v7 }
  0x2e   :  { %v936_v19 = vmul.f32 %v307_v41, %v307_v41  ;;  %v938_v27 = vmul.f32 %v308_v42, %v308_v42  ;;  %v940_v35 = vmul.f32 %v309_v48, %v309_v48  ;;  %v942_v49 = vmul.f32 %v310_v5, %v310_v5 }
  0x30   :  { %v322_v43 = vrot.slane %v936_v19, %v802_v8  ;;  %v326_v0 = vrot.slane %v936_v19, %v805_v9  ;;  %v330_v1 = vrot.slane %v936_v19, %v808_v10  ;;  %v334_v3 = vrot.slane %v936_v19, %v811_v11 }
  0x31   :  { %v338_v4 = vrot.slane %v936_v19, %v814_v12  ;;  %v342_v50 = vrot.slane %v936_v19, %v817_v13  ;;  %v346_v51 = vrot.slane %v936_v19, %v820_v14  ;;  %v350_v20 = vrot.slane %v936_v19, %v823_v15 }
  0x32   :  { %v354_v28 = vrot.slane %v938_v27, %v802_v8  ;;  %v358_v36 = vrot.slane %v938_v27, %v805_v9  ;;  %v362_v44 = vrot.slane %v938_v27, %v808_v10  ;;  %v366_v21 = vrot.slane %v938_v27, %v811_v11 }
  0x33   :  { %v370_v29 = vrot.slane %v938_v27, %v814_v12  ;;  %v374_v37 = vrot.slane %v938_v27, %v817_v13  ;;  %v378_v45 = vrot.slane %v938_v27, %v820_v14  ;;  %v382_v52 = vrot.slane %v938_v27, %v823_v15 }
  0x34   :  { %v386_v53 = vrot.slane %v940_v35, %v802_v8  ;;  %v390_v22 = vrot.slane %v940_v35, %v805_v9  ;;  %v394_v30 = vrot.slane %v940_v35, %v808_v10  ;;  %v398_v38 = vrot.slane %v940_v35, %v811_v11 }
  0x35   :  { %v402_v54 = vrot.slane %v940_v35, %v814_v12  ;;  %v406_v46 = vrot.slane %v940_v35, %v817_v13  ;;  %v410_v55 = vrot.slane %v940_v35, %v820_v14  ;;  %v414_v56 = vrot.slane %v940_v35, %v823_v15 }
  0x36   :  { %v418_v57 = vrot.slane %v942_v49, %v802_v8  ;;  %v422_v58 = vrot.slane %v942_v49, %v805_v9  ;;  %v426_v23 = vrot.slane %v942_v49, %v808_v10  ;;  %v430_v59 = vrot.slane %v942_v49, %v811_v11 }
  0x37   :  { %v434_v60 = vrot.slane %v942_v49, %v814_v12  ;;  %v438_v61 = vrot.slane %v942_v49, %v817_v13  ;;  %v442_v62 = vrot.slane %v942_v49, %v820_v14  ;;  %v446_v8 = vrot.slane %v942_v49, %v823_v15 }
  0x38   :  { %v479_v9 = vsel %vm183_vm0, %v322_v43, 0.0  ;;  %v480_v63 = vsel %vm183_vm0, %v354_v28, 0.0  ;;  %v482_v10 = vsel %vm183_vm0, %v386_v53, 0.0  ;;  %v484_v11 = vsel %vm183_vm0, %v418_v57, 0.0 }
  0x39   :  { %v481_v2 = vadd.f32 %v480_v63, %v479_v9  ;;  %v486_v12 = vsel %vm183_vm0, %v326_v0, 0.0  ;;  %v487_v31 = vsel %vm183_vm0, %v358_v36, 0.0  ;;  %v489_v13 = vsel %vm183_vm0, %v390_v22, 0.0 }
  0x3a   :  { %v488_v6 = vadd.f32 %v487_v31, %v486_v12  ;;  %v491_v39 = vsel %vm183_vm0, %v422_v58, 0.0  ;;  %v493_v16 = vsel %vm183_vm0, %v330_v1, 0.0  ;;  %v494_v47 = vsel %vm183_vm0, %v362_v44, 0.0 }
  0x3b   :  { %v483_v17 = vadd.f32 %v482_v10, %v481_v2  ;;  %v495_v24 = vadd.f32 %v494_v47, %v493_v16  ;;  %v496_v25 = vsel %vm183_vm0, %v394_v30, 0.0  ;;  %v498_v32 = vsel %vm183_vm0, %v426_v23, 0.0 }
  0x3c   :  { %v490_v18 = vadd.f32 %v489_v13, %v488_v6  ;;  %v500_v33 = vsel %vm183_vm0, %v334_v3, 0.0  ;;  %v501_v26 = vsel %vm183_vm0, %v366_v21, 0.0  ;;  %v503_v40 = vsel %vm183_vm0, %v398_v38, 0.0 }
  0x3d   :  { %v485_v34 = vadd.f32 %v484_v11, %v483_v17  ;;  %v497_v7 = vadd.f32 %v496_v25, %v495_v24  ;;  %v502_v41 = vadd.f32 %v501_v26, %v500_v33  ;;  %v505_v42 = vsel %vm183_vm0, %v430_v59, 0.0 }
  0x3e   :  { %v492_v48 = vadd.f32 %v491_v39, %v490_v18  ;;  %v507_v5 = vsel %vm183_vm0, %v338_v4, 0.0  ;;  %v508_v35 = vsel %vm183_vm0, %v370_v29, 0.0  ;;  %v510_v49 = vsel %vm183_vm0, %v402_v54, 0.0 }
  0x3f   :  { %v499_v43 = vadd.f32 %v498_v32, %v497_v7  ;;  %v504_v0 = vadd.f32 %v503_v40, %v502_v41  ;;  %v509_v1 = vadd.f32 %v508_v35, %v507_v5  ;;  %v512_v3 = vsel %vm183_vm0, %v434_v60, 0.0 }
  0x40   :  { %v514_v28 = vsel %vm183_vm0, %v342_v50, 0.0  ;;  %v515_v36 = vsel %vm183_vm0, %v374_v37, 0.0  ;;  %v517_v44 = vsel %vm183_vm0, %v406_v46, 0.0  ;;  %v519_v21 = vsel %vm183_vm0, %v438_v61, 0.0 }
  0x41   :  { %v506_v53 = vadd.f32 %v505_v42, %v504_v0  ;;  %v511_v22 = vadd.f32 %v510_v49, %v509_v1  ;;  %v516_v4 = vadd.f32 %v515_v36, %v514_v28  ;;  %v521_v29 = vsel %vm183_vm0, %v346_v51, 0.0 }
  0x42   :  { %v522_v30 = vsel %vm183_vm0, %v378_v45, 0.0  ;;  %v524_v38 = vsel %vm183_vm0, %v410_v55, 0.0  ;;  %v526_v50 = vsel %vm183_vm0, %v442_v62, 0.0  ;;  %v528_v37 = vsel %vm183_vm0, %v350_v20, 0.0 }
  0x43   :  { %v513_v54 = vadd.f32 %v512_v3, %v511_v22  ;;  %v518_v46 = vadd.f32 %v517_v44, %v516_v4  ;;  %v523_v57 = vadd.f32 %v522_v30, %v521_v29  ;;  %v529_v14 = vsel %vm183_vm0, %v382_v52, 0.0 }
  0x44   :  { %v530_v51 = vadd.f32 %v529_v14, %v528_v37  ;;  %v531_v45 = vsel %vm183_vm0, %v414_v56, 0.0  ;;  %v533_v55 = vsel %vm183_vm0, %v446_v8, 0.0  ;;  %v535_v58 = vmul.f32 0.33333334, %v485_v34 }
  0x45   :  { %v520_v23 = vadd.f32 %v519_v21, %v518_v46  ;;  %v525_v59 = vadd.f32 %v524_v38, %v523_v57  ;;  %v536_v60 = vmul.f32 0.33333334, %v492_v48  ;;  %v537_v19 = vmul.f32 0.33333334, %v499_v43 }
  0x46   :  { %v532_v61 = vadd.f32 %v531_v45, %v530_v51  ;;  %v538_v20 = vmul.f32 0.33333334, %v506_v53  ;;  %v539_v62 = vmul.f32 0.33333334, %v513_v54  ;;  %v543_v9 = vadd.f32 1e-08, %v535_v58 }
  0x47   :  { %v527_v63 = vadd.f32 %v526_v50, %v525_v59  ;;  %v540_v10 = vmul.f32 0.33333334, %v520_v23  ;;  %v544_v11 = vadd.f32 1e-08, %v536_v60  ;;  %v545_v15 = vadd.f32 1e-08, %v537_v19 }
  0x48   :  { %v534_v27 = vadd.f32 %v533_v55, %v532_v61  ;;  %704 = vrsqrt.f32 %v543_v9  ;;  %v1049_v2 = vadd.f32 1e-08, %v538_v20  ;;  %v1051_v8 = vadd.f32 1e-08, %v539_v62 }
  0x49   :  { %v541_v52 = vmul.f32 0.33333334, %v527_v63  ;;  %706 = vrsqrt.f32 %v544_v11  ;;  %v1053_v12 = vadd.f32 1e-08, %v540_v10  ;;  %vm553_vm1 = vcmp.eq.f32.partialorder %v543_v9, inf }
  0x4a   :  { %v542_v56 = vmul.f32 0.33333334, %v534_v27  ;;  %708 = vrsqrt.f32 %v545_v15  ;;  %vm555_vm2 = vcmp.eq.f32.partialorder %v543_v9, 0.0  ;;  %v556_v6 = vand.u32 2147483648, %v543_v9 }
  0x4b   :  { %v1055_v31 = vadd.f32 1e-08, %v541_v52  ;;  %710 = vrsqrt.f32 %v1049_v2  ;;  %vm560_vm3 = vcmp.eq.f32.partialorder %v544_v11, inf  ;;  %vm562_vm4 = vcmp.eq.f32.partialorder %v544_v11, 0.0 }
  0x4c   :  { %v1057_v13 = vadd.f32 1e-08, %v542_v56  ;;  %712 = vrsqrt.f32 %v1051_v8  ;;  %v563_v16 = vand.u32 2147483648, %v544_v11  ;;  %vm567_vm5 = vcmp.eq.f32.partialorder %v545_v15, inf }
  0x4d   :  { %714 = vrsqrt.f32 %v1053_v12  ;;  %vm569_vm6 = vcmp.eq.f32.partialorder %v545_v15, 0.0  ;;  %v570_v17 = vand.u32 2147483648, %v545_v15  ;;  %vm574_vm7 = vcmp.eq.f32.partialorder %v1049_v2, inf }
  0x4e   :  { %716 = vrsqrt.f32 %v1055_v31  ;;  %vm576_vm8 = vcmp.eq.f32.partialorder %v1049_v2, 0.0  ;;  %v577_v25 = vand.u32 2147483648, %v1049_v2  ;;  %vm581_vm9 = vcmp.eq.f32.partialorder %v1051_v8, inf }
  0x4f   :  { %718 = vrsqrt.f32 %v1057_v13  ;;  %vm583_vm10 = vcmp.eq.f32.partialorder %v1051_v8, 0.0  ;;  %v584_v32 = vand.u32 2147483648, %v1051_v8  ;;  %vm588_vm11 = vcmp.eq.f32.partialorder %v1053_v12, inf }
  0x50   :  { %vm590_vm12 = vcmp.eq.f32.partialorder %v1053_v12, 0.0  ;;  %v591_v7 = vand.u32 2147483648, %v1053_v12  ;;  %vm595_vm13 = vcmp.eq.f32.partialorder %v1055_v31, inf  ;;  %vm597_vm14 = vcmp.eq.f32.partialorder %v1055_v31, 0.0 }
  0x51   :  { %v598_v48 = vand.u32 2147483648, %v1055_v31  ;;  %vm602_vm15 = vcmp.eq.f32.partialorder %v1057_v13, inf  ;;  %v605_v37 = vand.u32 2147483648, %v1057_v13 }
  0x52   :  { %v705_v39 = vpop.eup %704 }
  0x53   :  { %v552_v47 = vmul.f32 %v705_v39, %v543_v9  ;;  %v707_v24 = vpop.eup %706 }
  0x54   :  { %v709_v18 = vpop.eup %708  ;;  %v559_v26 = vmul.f32 %v707_v24, %v544_v11 }
  0x55   :  { %v554_v33 = vsel %vm553_vm1, %v543_v9, %v552_v47  ;;  %v566_v34 = vmul.f32 %v709_v18, %v545_v15  ;;  %v711_v41 = vpop.eup %710  ;;  %vm604_vm1 = vcmp.eq.f32.partialorder %v1057_v13, 0.0 }
  0x56   :  { %v557_v40 = vsel %vm555_vm2, %v556_v6, %v554_v33  ;;  %v561_v42 = vsel %vm560_vm3, %v544_v11, %v559_v26  ;;  %v713_v35 = vpop.eup %712  ;;  %v573_v0 = vmul.f32 %v711_v41, %v1049_v2  ;;  %vm632_vm2 = vcmask 0  }
  0x57   :  { %v607_v5 = vsel %vm183_vm0, %v557_v40, 0.0  ;;  %v564_v49 = vsel %vm562_vm4, %v563_v16, %v561_v42  ;;  %v568_v43 = vsel %vm567_vm5, %v545_v15, %v566_v34  ;;  %v715_v1 = vpop.eup %714  ;;  %v580_v28 = vmul.f32 %v713_v35, %v1051_v8 }
  0x58   :  { %v571_v3 = vsel %vm569_vm6, %v570_v17, %v568_v43  ;;  %v608_v36 = vsel %vm183_vm0, %v564_v49, 0.0  ;;  %v717_v44 = vpop.eup %716  ;;  %v575_v21 = vsel %vm574_vm7, %v1049_v2, %v573_v0  ;;  %v587_v53 = vmul.f32 %v715_v1, %v1053_v12 }
  0x59   :  { %v609_v22 = vadd.f32 %v608_v36, %v607_v5  ;;  %v610_v4 = vsel %vm183_vm0, %v571_v3, 0.0  ;;  %v719_v29 = vpop.eup %718  ;;  %v578_v30 = vsel %vm576_vm8, %v577_v25, %v575_v21  ;;  %v582_v38 = vsel %vm581_vm9, %v1051_v8, %v580_v28 }
  0x5a   :  { %v594_v50 = vmul.f32 %v717_v44, %v1055_v31  ;;  %v585_v54 = vsel %vm583_vm10, %v584_v32, %v582_v38  ;;  %v589_v46 = vsel %vm588_vm11, %v1053_v12, %v587_v53  ;;  %v601_v57 = vmul.f32 %v719_v29, %v1057_v13 }
  0x5b   :  { %v611_v14 = vadd.f32 %v610_v4, %v609_v22  ;;  %v592_v51 = vsel %vm590_vm12, %v591_v7, %v589_v46  ;;  %v612_v55 = vsel %vm183_vm0, %v578_v30, 0.0  ;;  %v614_v58 = vsel %vm183_vm0, %v585_v54, 0.0 }
  0x5c   :  { %v596_v45 = vsel %vm595_vm13, %v1055_v31, %v594_v50  ;;  %v603_v59 = vsel %vm602_vm15, %v1057_v13, %v601_v57  ;;  %v616_v19 = vsel %vm183_vm0, %v592_v51, 0.0 }
  0x5d   :  { %v599_v23 = vsel %vm597_vm14, %v598_v48, %v596_v45  ;;  %v613_v60 = vadd.f32 %v612_v55, %v611_v14  ;;  %v606_v61 = vsel %vm604_vm1, %v605_v37, %v603_v59 }
  0x5e   :  { %v618_v62 = vsel %vm183_vm0, %v599_v23, 0.0  ;;  %v620_v63 = vsel %vm183_vm0, %v606_v61, 0.0 }
  0x5f   :  { %v615_v20 = vadd.f32 %v614_v58, %v613_v60 }
  0x61   :  { %v617_v9 = vadd.f32 %v616_v19, %v615_v20 }
  0x63   :  { %v619_v10 = vadd.f32 %v618_v62, %v617_v9 }
  0x65   :  { %v621_v11 = vadd.f32 %v620_v63, %v619_v10 }
  0x67   :  { %622 = vadd.xlane.f32.xlu0 %v621_v11 }
  0xf4   :  { %v623_v15 = vpop.xlane.xlu0 %622 }
  0xf5   :  { %v624_v27 = vrot.slane %v623_v15, 4 }
  0xf7   :  { %v625_v52 = vadd.f32 %v624_v27, %v623_v15 }
  0xf9   :  { %v626_v2 = vrot.slane %v625_v52, 2 }
  0xfb   :  { %v627_v56 = vadd.f32 %v626_v2, %v625_v52 }
  0xfd   :  { %v628_v8 = vrot.slane %v627_v56, 1 }
  0xff   :  { %v629_v12 = vadd.f32 %v628_v8, %v627_v56 }
 0x101   :  { %700 = vpush %v629_v12 }
 0x132   :  { %s701_s25 = spop %700 }
 0x133   :  { %v631_v31 = vstv %s701_s25 }
 0x134   :  { %633 = vst.msk [vmem:[#allocation3] sm:$0x1] %vm632_vm2, %v631_v31 }
 0x135   :  { %731 = shalt.err (!%p728_p4)
}
 0x136   :  { %s732_s30 = scalar_lea.hbm %s1137_s2, 16 }
 0x137   :  { %p733_p5 = scmp.ne.s32.totalorder %s1137_s2, %s732_s30  ;;  %p736_p6 = scmp.lt.u32.totalorder %s732_s30, %s1137_s2 }
 0x139   :  { %p738_p7 = pnand %p736_p6, %p733_p5 }
 0x13b   :  { %741 = shalt.err (!%p738_p7)
}
 0x13c   :  { %689 = dma.vmem_to_hbm [thread:$0]  %s687_s24, 16, %s1137_s2, [#allocation4]  }
 0x13d   :  { %742 = dma.done.wait [#allocation4], 16  }
 0x13e   :  { %743 = vsyncadd [#allocation4], 4294967280 }
 0x13f   :  { %695 = vsyncpa [#allocation4], 1 }

</bundles_post_ra>
